<compile_context>
chip_gen: v7x
topology: tpu7x:2x2x1
jax: 0.10.0
libtpu: 0.0.40
codegen_flags: <defaults>
</compile_context>

<pallas_src>
import functools

import jax
import jax.numpy as jnp
from jax.experimental import pallas as pl
from jax.experimental.pallas import tpu as pltpu

EPS = 1e-5
_HALO = 128  # leading pad / halo block width (one lane tile)


def _round_up(x, m):
    return ((x + m - 1) // m) * m


# ----------------------------- Pallas kernel -------------------------------- #

def _conv_bn_kernel(xl_ref, xm_ref, xr_ref, m_ref, w_ref, sc_ref, sh_ref,
                    out_ref, stats_ref, *, shifts, tm, apply_act, compute_dtype):
    """Fused [BN-apply+ReLU of previous layer] -> 3x3 conv -> partial BN stats.

    xl/xm/xr: (C, 128/tm/128) column blocks of the flat activation (f32).
    m:        (1, 1, tm+256) static interior mask for this tile's stitched window.
    w:        (Cout, 9*C) stacked-tap weights (tap k = dy*3+dx on the K axis).
    out:      (Cout, tm) conv output block (f32, lane-dense store).
    stats:    (1, 2*Cout, 1) per-tile [sum; sum-of-squares] over valid columns.
    """
    # Stitch [left halo | main | right halo] -> (C, L), L = tm + 256.
    xv = jnp.concatenate([xl_ref[...], xm_ref[...], xr_ref[...]], axis=1)
    interior = m_ref[0] > 0.5                                    # (1, L)

    if apply_act:
        # Previous layer's BatchNorm (batch stats) + ReLU, fused into this load path.
        xv = jnp.maximum(xv * sc_ref[...] + sh_ref[...], 0.0)
    # Re-impose the conv zero padding (and kill any garbage in pad/halo columns).
    xv = jnp.where(interior, xv, 0.0).astype(compute_dtype)

    # im2col along sublanes: each tap (dy, dx) is a lane rotation (XLU) + aligned slice.
    cols = []
    for s in shifts:
        shifted = xv if s == 0 else pltpu.roll(xv, s, axis=1)
        cols.append(shifted[:, _HALO:_HALO + tm])
    slab = jnp.concatenate(cols, axis=0)                         # (9*C, tm)

    # Single MXU matmul, f32 accumulation.
    acc = jnp.dot(w_ref[...], slab, preferred_element_type=jnp.float32)  # (Cout, tm)

    # Partial BN statistics over valid (interior) output columns only.
    valid = interior[:, _HALO:_HALO + tm]                        # (1, tm)
    accv = jnp.where(valid, acc, 0.0)   # where (not *) so stray inf/nan can't leak
    z = jnp.concatenate([accv, accv * accv], axis=0)             # (2*Cout, tm)
    stats_ref[0] = jnp.sum(z, axis=1, keepdims=True)             # (2*Cout, 1)

    out_ref[...] = acc.astype(out_ref.dtype)                     # lane-dense f32 store


# ------------------------------ pallas_call wrapper ------------------------- #

def _conv_bn_layer(xa, mask_tiles, w2d, sc, sh, *, cin_p, cout_p, tm, n_tiles, warr,
                   wp, apply_act, compute_dtype):
    hb = tm // _HALO
    L = tm + 2 * _HALO
    # Roll amount that puts tap (dy, dx)'s window start on stitched column _HALO:
    # the tap window starts at  _HALO + dy*Wp + dx - (Wp+1)  -> roll by the complement.
    shifts = tuple((wp + 1 - dy * wp - dx) % L for dy in range(3) for dx in range(3))

    kernel = functools.partial(_conv_bn_kernel, shifts=shifts, tm=tm,
                               apply_act=apply_act, compute_dtype=compute_dtype)

    return pl.pallas_call(
        kernel,
        out_shape=(
            jax.ShapeDtypeStruct((cout_p, warr), jnp.float32),            # conv output
            jax.ShapeDtypeStruct((n_tiles, 2 * cout_p, 1), jnp.float32),  # [sum; sumsq]
        ),
        grid_spec=pltpu.PrefetchScalarGridSpec(
            num_scalar_prefetch=0,
            grid=(n_tiles,),
            in_specs=[
                # left halo (clamped at t=0; those columns are non-interior -> masked to 0)
                pl.BlockSpec((cin_p, _HALO), lambda t: (0, jnp.maximum(t * hb - 1, 0))),
                pl.BlockSpec((cin_p, tm), lambda t: (0, t)),               # main block
                pl.BlockSpec((cin_p, _HALO), lambda t: (0, (t + 1) * hb)),  # right halo
                pl.BlockSpec((1, 1, L), lambda t: (t, 0, 0)),              # interior mask
                pl.BlockSpec((cout_p, 9 * cin_p), lambda t: (0, 0)),       # stacked weights
                pl.BlockSpec((cin_p, 1), lambda t: (0, 0)),                # prev BN scale
                pl.BlockSpec((cin_p, 1), lambda t: (0, 0)),                # prev BN shift
            ],
            out_specs=[
                pl.BlockSpec((cout_p, tm), lambda t: (0, t)),              # lane-dense out
                pl.BlockSpec((1, 2 * cout_p, 1), lambda t: (t, 0, 0)),     # per-tile stats
            ],
        ),
        compiler_params=pltpu.CompilerParams(
            dimension_semantics=("parallel",),
            # v7x has 64 MiB VMEM (vs 128 on v5e/v6e); working set here is far below this.
            vmem_limit_bytes=32 * 1024 * 1024),
    )(xa, xa, xa, mask_tiles, w2d, sc, sh)


# --------------------------------- Forward ---------------------------------- #

def conv_block_forward(x_nchw, params, *, tile_cols=2048, compute_dtype=jnp.bfloat16,
                       min_tiles=1):
    """ConvBlock.forward.  x_nchw: (N, Cin, H, W).  params: list of (w, gamma, beta).

    min_tiles=1 -> single grid step when the problem fits one tile (best on 1-TC v5e/v6e);
    min_tiles=2 -> balanced 2-way 'parallel' split so v7x's two TensorCores both work.
    """
    N, cin0, H, W = map(int, x_nchw.shape)
    Hp, Wp = H + 2, W + 2
    assert Wp + 1 <= _HALO, "TODO(synk): widen halo blocks for W > 125"

    body = N * Hp * Wp
    need = _HALO + body                        # columns that must be covered by main blocks
    tm = min(int(tile_cols), _round_up(need, 128))
    n_tiles = max(pl.cdiv(need, tm), int(min_tiles))
    tm = _round_up(pl.cdiv(need, n_tiles), 128)      # balanced, 128-multiple tiles
    n_tiles = max(pl.cdiv(need, tm), int(min_tiles))
    warr = n_tiles * tm + _HALO                # +_HALO so the last right-halo read is in-bounds
    L = tm + 2 * _HALO

    # Static interior mask.  Extended column q corresponds to array column q - _HALO;
    # array column c is interior iff c - _HALO indexes a non-pad (n, i, j) position.
    interior_body = jnp.pad(jnp.ones((N, H, W), jnp.float32),
                            ((0, 0), (1, 1), (1, 1))).reshape(body)
    mask_ext = jnp.zeros((warr + _HALO,), jnp.float32)
    mask_ext = mask_ext.at[2 * _HALO:2 * _HALO + body].set(interior_body)
    mask_tiles = jnp.stack([mask_ext[t * tm:t * tm + L]
                            for t in range(n_tiles)]).reshape(n_tiles, 1, L)

    # Layer-1 input: channels-first flat layout, rows zero-padded to a sublane multiple.
    cin_p = _round_up(cin0, 8)
    xf = jnp.transpose(jnp.pad(x_nchw.astype(jnp.float32),
                               ((0, 0), (0, 0), (1, 1), (1, 1))),
                       (1, 0, 2, 3)).reshape(cin0, body)
    cur = jnp.zeros((cin_p, warr), jnp.float32).at[:cin0, _HALO:_HALO + body].set(xf)

    count = float(N * H * W)
    cin = cin0
    scale = shift = None

    for li, (w, gamma, beta) in enumerate(params):
        cout = int(w.shape[0])
        assert int(w.shape[1]) == cin
        cout_p = _round_up(cout, 8)

        # (Cout, Cin, 3, 3) -> (Cout_p, 9*Cin_p) stacked-tap weight, tap k = dy*3 + dx.
        w4 = jnp.zeros((cout_p, 3, 3, cin_p), jnp.float32)
        w4 = w4.at[:cout, :, :, :cin].set(
            jnp.transpose(w.astype(jnp.float32), (0, 2, 3, 1)))
        w2d = w4.reshape(cout_p, 9 * cin_p).astype(compute_dtype)

        if li > 0:
            sc, sh = scale, shift              # previous layer's BN, fused into this conv
        else:
            sc = jnp.ones((cin_p, 1), jnp.float32)
            sh = jnp.zeros((cin_p, 1), jnp.float32)

        y, stats = _conv_bn_layer(
            cur, mask_tiles, w2d, sc, sh, cin_p=cin_p, cout_p=cout_p, tm=tm,
            n_tiles=n_tiles, warr=warr, wp=Wp, apply_act=(li > 0),
            compute_dtype=compute_dtype)

        # Tiny cross-tile reduction of in-kernel partial sums -> train-mode batch stats.
        tot = jnp.sum(stats[:, :, 0], axis=0)                 # (2*Cout_p,)
        mean = tot[:cout_p] / count
        var = jnp.maximum(tot[cout_p:] / count - mean * mean, 0.0)
        g = jnp.zeros((cout_p,), jnp.float32).at[:cout].set(gamma.astype(jnp.float32))
        b = jnp.zeros((cout_p,), jnp.float32).at[:cout].set(beta.astype(jnp.float32))
        scale = (g / jnp.sqrt(var + EPS)).reshape(cout_p, 1)
        shift = b.reshape(cout_p, 1) - mean.reshape(cout_p, 1) * scale

        cur, cin, cin_p = y, cout, cout_p

    # Final BN + ReLU folded into the output glue (XLA fuses with the slice/transpose).
    y = cur[:cin, _HALO:_HALO + body].reshape(cin, N, Hp, Wp)[:, :, 1:H + 1, 1:W + 1]
    y = jnp.maximum(y * scale[:cin].reshape(cin, 1, 1, 1)
                    + shift[:cin].reshape(cin, 1, 1, 1), 0.0)
    return jnp.transpose(y, (1, 0, 2, 3))


# ------------------------ Pure-JAX reference (check) ------------------------ #

def _reference(x_nchw, params):
    x = x_nchw.astype(jnp.float32)
    for (w, gamma, beta) in params:
        x = jax.lax.conv_general_dilated(
            x, w, window_strides=(1, 1), padding=((1, 1), (1, 1)),
            dimension_numbers=("NCHW", "OIHW", "NCHW"))
        mean = jnp.mean(x, axis=(0, 2, 3), keepdims=True)
        var = jnp.var(x, axis=(0, 2, 3), keepdims=True)
        x = (x - mean) / jnp.sqrt(var + EPS)
        x = x * gamma.reshape(1, -1, 1, 1) + beta.reshape(1, -1, 1, 1)
        x = jnp.maximum(x, 0.0)
    return x


# ---------------------------------- Main ------------------------------------ #

if __name__ == "__main__":
    in_channels, out_channels = 4, 8
    N, H, W = 2, 16, 16

    key = jax.random.PRNGKey(0)
    kx, kw1, kw2, kg1, kb1, kg2, kb2 = jax.random.split(key, 7)

    x = jax.random.normal(kx, (N, in_channels, H, W), dtype=jnp.float32)

    # Parameters matching ConvBlock.__init__ (conv bias=False; BN affine params exercised).
    w1 = jax.random.normal(kw1, (out_channels, in_channels, 3, 3), jnp.float32) * 0.1
    w2 = jax.random.normal(kw2, (out_channels, out_channels, 3, 3), jnp.float32) * 0.1
    g1 = 1.0 + 0.1 * jax.random.normal(kg1, (out_channels,), jnp.float32)
    b1 = 0.1 * jax.random.normal(kb1, (out_channels,), jnp.float32)
    g2 = 1.0 + 0.1 * jax.random.normal(kg2, (out_channels,), jnp.float32)
    b2 = 0.1 * jax.random.normal(kb2, (out_channels,), jnp.float32)
    params = [(w1, g1, b1), (w2, g2, b2)]

    ref = jax.block_until_ready(_reference(x, params))

    # f32 operands, single-tile grid (v5e/v6e default): strict numerics check.
    out_f32 = jax.block_until_ready(
        conv_block_forward(x, params, compute_dtype=jnp.float32))
    assert out_f32.shape == (N, out_channels, H, W), out_f32.shape
    assert jnp.allclose(out_f32, ref, atol=1e-3, rtol=1e-3), \
        float(jnp.max(jnp.abs(out_f32 - ref)))

    # f32 operands, forced balanced 2-way split (v7x-style): exercises the halo/multi-tile path.
    out_2t = jax.block_until_ready(
        conv_block_forward(x, params, compute_dtype=jnp.float32, min_tiles=2))
    assert jnp.allclose(out_2t, ref, atol=1e-3, rtol=1e-3), \
        float(jnp.max(jnp.abs(out_2t - ref)))

    # bf16 matmul operands (default fast path; f32 accumulation, f32 stored activations).
    out_bf16 = jax.block_until_ready(conv_block_forward(x, params))
    assert out_bf16.shape == (N, out_channels, H, W), out_bf16.shape
    assert jnp.allclose(out_bf16, ref, atol=1e-1, rtol=1e-1), \
        float(jnp.max(jnp.abs(out_bf16 - ref)))

    print("KERNEL_OK")
</pallas_src>

<mosaic_0001>
module attributes {stable_mosaic.version = 11 : i64} {
  func.func @_conv_bn_kernel(%arg0: i32, %arg1: memref<8x128xf32, #tpu.memory_space<vmem>>, %arg2: memref<8x896xf32, #tpu.memory_space<vmem>>, %arg3: memref<8x128xf32, #tpu.memory_space<vmem>>, %arg4: memref<1x1x1152xf32, #tpu.memory_space<vmem>>, %arg5: memref<8x72xf32, #tpu.memory_space<vmem>>, %arg6: memref<8x1xf32, #tpu.memory_space<vmem>>, %arg7: memref<8x1xf32, #tpu.memory_space<vmem>>, %arg8: memref<8x896xf32, #tpu.memory_space<vmem>>, %arg9: memref<1x16x1xf32, #tpu.memory_space<vmem>>) attributes {dimension_semantics = [#tpu.dimension_semantics<parallel>], iteration_bounds = array<i64: 1>, scalar_prefetch = 0 : i64, scratch_operands = 0 : i64, tpu.core_type = #tpu.core_type<tc>, window_params = [{transform_indices = @transform_0, window_bounds = array<i64: 8, 128>}, {transform_indices = @transform_1, window_bounds = array<i64: 8, 896>}, {transform_indices = @transform_2, window_bounds = array<i64: 8, 128>}, {transform_indices = @transform_3, window_bounds = array<i64: 1, 1, 1152>}, {pipeline_mode = #tpu.pipeline_mode<synchronous>, transform_indices = @transform_4, window_bounds = array<i64: 8, 72>}, {pipeline_mode = #tpu.pipeline_mode<synchronous>, transform_indices = @transform_5, window_bounds = array<i64: 8, 1>}, {pipeline_mode = #tpu.pipeline_mode<synchronous>, transform_indices = @transform_6, window_bounds = array<i64: 8, 1>}, {transform_indices = @transform_7, window_bounds = array<i64: 8, 896>}, {transform_indices = @transform_8, window_bounds = array<i64: 1, 16, 1>}]} {
    %c0 = arith.constant 0 : index
    %c0_0 = arith.constant 0 : index
    %0 = vector.load %arg1[%c0, %c0_0] : memref<8x128xf32, #tpu.memory_space<vmem>>, vector<8x128xf32>
    %c0_1 = arith.constant 0 : index
    %c0_2 = arith.constant 0 : index
    %1 = vector.load %arg2[%c0_1, %c0_2] : memref<8x896xf32, #tpu.memory_space<vmem>>, vector<8x896xf32>
    %c0_3 = arith.constant 0 : index
    %c0_4 = arith.constant 0 : index
    %2 = vector.load %arg3[%c0_3, %c0_4] : memref<8x128xf32, #tpu.memory_space<vmem>>, vector<8x128xf32>
    %3 = tpu.concatenate %0, %1, %2 in 1 : vector<8x128xf32>, vector<8x896xf32>, vector<8x128xf32> -> vector<8x1152xf32>
    %c0_5 = arith.constant 0 : index
    %c0_6 = arith.constant 0 : index
    %c0_7 = arith.constant 0 : index
    %4 = vector.load %arg4[%c0_5, %c0_6, %c0_7] : memref<1x1x1152xf32, #tpu.memory_space<vmem>>, vector<1x1x1152xf32>
    %5 = vector.shape_cast %4 : vector<1x1x1152xf32> to vector<1x1152xf32>
    %cst = arith.constant 5.000000e-01 : f32
    %6 = vector.broadcast %cst : f32 to vector<1x1152xf32>
    %7 = arith.cmpf ogt, %5, %6 : vector<1x1152xf32>
    %cst_8 = arith.constant 0.000000e+00 : f32
    %8 = vector.shape_cast %7 : vector<1x1152xi1> to vector<1x1152xi1>
    %9 = vector.broadcast %8 : vector<1x1152xi1> to vector<8x1152xi1>
    %10 = vector.broadcast %cst_8 : f32 to vector<8x1152xf32>
    %11 = arith.select %9, %3, %10 : vector<8x1152xi1>, vector<8x1152xf32>
    %c19_i32 = arith.constant 19 : i32
    %12 = tpu.dynamic_rotate %11 by %c19_i32 dim 1 : vector<8x1152xf32>, i32 -> vector<8x1152xf32>
    %13 = vector.extract_strided_slice %12 {offsets = [0, 128], sizes = [8, 896], strides = [1, 1]} : vector<8x1152xf32> to vector<8x896xf32>
    %c18_i32 = arith.constant 18 : i32
    %14 = tpu.dynamic_rotate %11 by %c18_i32 dim 1 : vector<8x1152xf32>, i32 -> vector<8x1152xf32>
    %15 = vector.extract_strided_slice %14 {offsets = [0, 128], sizes = [8, 896], strides = [1, 1]} : vector<8x1152xf32> to vector<8x896xf32>
    %c17_i32 = arith.constant 17 : i32
    %16 = tpu.dynamic_rotate %11 by %c17_i32 dim 1 : vector<8x1152xf32>, i32 -> vector<8x1152xf32>
    %17 = vector.extract_strided_slice %16 {offsets = [0, 128], sizes = [8, 896], strides = [1, 1]} : vector<8x1152xf32> to vector<8x896xf32>
    %c1_i32 = arith.constant 1 : i32
    %18 = tpu.dynamic_rotate %11 by %c1_i32 dim 1 : vector<8x1152xf32>, i32 -> vector<8x1152xf32>
    %19 = vector.extract_strided_slice %18 {offsets = [0, 128], sizes = [8, 896], strides = [1, 1]} : vector<8x1152xf32> to vector<8x896xf32>
    %20 = vector.extract_strided_slice %11 {offsets = [0, 128], sizes = [8, 896], strides = [1, 1]} : vector<8x1152xf32> to vector<8x896xf32>
    %c1151_i32 = arith.constant 1151 : i32
    %21 = tpu.dynamic_rotate %11 by %c1151_i32 dim 1 : vector<8x1152xf32>, i32 -> vector<8x1152xf32>
    %22 = vector.extract_strided_slice %21 {offsets = [0, 128], sizes = [8, 896], strides = [1, 1]} : vector<8x1152xf32> to vector<8x896xf32>
    %c1135_i32 = arith.constant 1135 : i32
    %23 = tpu.dynamic_rotate %11 by %c1135_i32 dim 1 : vector<8x1152xf32>, i32 -> vector<8x1152xf32>
    %24 = vector.extract_strided_slice %23 {offsets = [0, 128], sizes = [8, 896], strides = [1, 1]} : vector<8x1152xf32> to vector<8x896xf32>
    %c1134_i32 = arith.constant 1134 : i32
    %25 = tpu.dynamic_rotate %11 by %c1134_i32 dim 1 : vector<8x1152xf32>, i32 -> vector<8x1152xf32>
    %26 = vector.extract_strided_slice %25 {offsets = [0, 128], sizes = [8, 896], strides = [1, 1]} : vector<8x1152xf32> to vector<8x896xf32>
    %c1133_i32 = arith.constant 1133 : i32
    %27 = tpu.dynamic_rotate %11 by %c1133_i32 dim 1 : vector<8x1152xf32>, i32 -> vector<8x1152xf32>
    %28 = vector.extract_strided_slice %27 {offsets = [0, 128], sizes = [8, 896], strides = [1, 1]} : vector<8x1152xf32> to vector<8x896xf32>
    %29 = tpu.concatenate %13, %15, %17, %19, %20, %22, %24, %26, %28 in 0 : vector<8x896xf32>, vector<8x896xf32>, vector<8x896xf32>, vector<8x896xf32>, vector<8x896xf32>, vector<8x896xf32>, vector<8x896xf32>, vector<8x896xf32>, vector<8x896xf32> -> vector<72x896xf32>
    %c0_9 = arith.constant 0 : index
    %c0_10 = arith.constant 0 : index
    %30 = vector.load %arg5[%c0_9, %c0_10] : memref<8x72xf32, #tpu.memory_space<vmem>>, vector<8x72xf32>
    %cst_11 = arith.constant dense<0.000000e+00> : vector<8x896xf32>
    %31 = tpu.matmul %30, %29, %cst_11 {dimension_numbers = #tpu.dot_dimension_numbers<[1], [0], [0], [1], [0, 0, 1, 1], [], []>} : vector<8x72xf32>, vector<72x896xf32>, vector<8x896xf32> -> vector<8x896xf32>
    %32 = vector.extract_strided_slice %7 {offsets = [0, 128], sizes = [1, 896], strides = [1, 1]} : vector<1x1152xi1> to vector<1x896xi1>
    %cst_12 = arith.constant 0.000000e+00 : f32
    %33 = vector.shape_cast %32 : vector<1x896xi1> to vector<1x896xi1>
    %34 = vector.broadcast %33 : vector<1x896xi1> to vector<8x896xi1>
    %35 = vector.broadcast %cst_12 : f32 to vector<8x896xf32>
    %36 = arith.select %34, %31, %35 : vector<8x896xi1>, vector<8x896xf32>
    %37 = arith.mulf %36, %36 : vector<8x896xf32>
    %38 = tpu.concatenate %36, %37 in 0 : vector<8x896xf32>, vector<8x896xf32> -> vector<16x896xf32>
    %cst_13 = arith.constant dense<0.000000e+00> : vector<16xf32>
    %39 = vector.multi_reduction <add>, %38, %cst_13 [1] : vector<16x896xf32> to vector<16xf32>
    %40 = vector.shape_cast %39 : vector<16xf32> to vector<16x1xf32>
    %c0_14 = arith.constant 0 : index
    %c0_15 = arith.constant 0 : index
    %c0_16 = arith.constant 0 : index
    %41 = vector.load %arg9[%c0_14, %c0_15, %c0_16] : memref<1x16x1xf32, #tpu.memory_space<vmem>>, vector<1x16x1xf32>
    %42 = vector.shape_cast %41 : vector<1x16x1xf32> to vector<16x1xf32>
    %43 = vector.shape_cast %40 : vector<16x1xf32> to vector<1x16x1xf32>
    tpu.vector_store %arg9[%c0_14, %c0_15, %c0_16], %43 {strides = array<i32>} : memref<1x16x1xf32, #tpu.memory_space<vmem>>, vector<1x16x1xf32>,
    %c0_17 = arith.constant 0 : index
    %c0_18 = arith.constant 0 : index
    %44 = vector.load %arg8[%c0_17, %c0_18] : memref<8x896xf32, #tpu.memory_space<vmem>>, vector<8x896xf32>
    tpu.vector_store %arg8[%c0_17, %c0_18], %31 {strides = array<i32>} : memref<8x896xf32, #tpu.memory_space<vmem>>, vector<8x896xf32>,
    return
  }
  func.func @transform_0(%arg0: i32) -> (i32, i32) {
    %c7_i32 = arith.constant 7 : i32
    %0 = arith.muli %arg0, %c7_i32 : i32
    %c1_i32 = arith.constant 1 : i32
    %1 = arith.subi %0, %c1_i32 : i32
    %c0_i32 = arith.constant 0 : i32
    %2 = arith.maxsi %1, %c0_i32 : i32
    %c0_i32_0 = arith.constant 0 : i32
    %c0_i32_1 = arith.constant 0 : i32
    return %c0_i32_0, %2 : i32, i32
  }
  func.func @transform_1(%arg0: i32) -> (i32, i32) {
    %c0_i32 = arith.constant 0 : i32
    %c0_i32_0 = arith.constant 0 : i32
    return %c0_i32, %arg0 : i32, i32
  }
  func.func @transform_2(%arg0: i32) -> (i32, i32) {
    %c1_i32 = arith.constant 1 : i32
    %0 = arith.addi %arg0, %c1_i32 : i32
    %c7_i32 = arith.constant 7 : i32
    %1 = arith.muli %0, %c7_i32 : i32
    %c0_i32 = arith.constant 0 : i32
    %c0_i32_0 = arith.constant 0 : i32
    return %c0_i32, %1 : i32, i32
  }
  func.func @transform_3(%arg0: i32) -> (i32, i32, i32) {
    %c0_i32 = arith.constant 0 : i32
    %c0_i32_0 = arith.constant 0 : i32
    %c0_i32_1 = arith.constant 0 : i32
    return %arg0, %c0_i32, %c0_i32_0 : i32, i32, i32
  }
  func.func @transform_4(%arg0: i32) -> (i32, i32) {
    %c0_i32 = arith.constant 0 : i32
    %c0_i32_0 = arith.constant 0 : i32
    %c0_i32_1 = arith.constant 0 : i32
    return %c0_i32, %c0_i32_0 : i32, i32
  }
  func.func @transform_5(%arg0: i32) -> (i32, i32) {
    %c0_i32 = arith.constant 0 : i32
    %c0_i32_0 = arith.constant 0 : i32
    %c0_i32_1 = arith.constant 0 : i32
    return %c0_i32, %c0_i32_0 : i32, i32
  }
  func.func @transform_6(%arg0: i32) -> (i32, i32) {
    %c0_i32 = arith.constant 0 : i32
    %c0_i32_0 = arith.constant 0 : i32
    %c0_i32_1 = arith.constant 0 : i32
    return %c0_i32, %c0_i32_0 : i32, i32
  }
  func.func @transform_7(%arg0: i32) -> (i32, i32) {
    %c0_i32 = arith.constant 0 : i32
    %c0_i32_0 = arith.constant 0 : i32
    return %c0_i32, %arg0 : i32, i32
  }
  func.func @transform_8(%arg0: i32) -> (i32, i32, i32) {
    %c0_i32 = arith.constant 0 : i32
    %c0_i32_0 = arith.constant 0 : i32
    %c0_i32_1 = arith.constant 0 : i32
    return %arg0, %c0_i32, %c0_i32_0 : i32, i32, i32
  }
}

</mosaic_0001>

<bundles_post_ra>
// kernel: tpu_custom_call.1
= control target key start
LH: loop header
LB: loop body
LE: loop exit
PB: predicated region body
PF: predicated region fallthrough
CT: control target
= control target key end

     0   :  { %14 = vsyncpa [#allocation3], 0  ;;  %s1578_s0 = inlined_call_operand.hbm [shape: f32[8,1024], index: 0, kind: input, shape index: {}]   ;;  %s1579_s1 = inlined_call_operand.hbm [shape: f32[8,1024], index: 1, kind: input, shape index: {}]   ;;  %s1580_s2 = inlined_call_operand.hbm [shape: f32[8,1024], index: 2, kind: input, shape index: {}]   ;;  %s1581_s3 = inlined_call_operand.vmem [shape: f32[1,1,1152], index: 3, kind: input, shape index: {}]   ;;  %s1582_s4 = inlined_call_operand.vmem [shape: f32[8,72], index: 4, kind: input, shape index: {}]   ;;  %s1583_s5 = inlined_call_operand.vmem [shape: f32[8,1], index: 5, kind: input, shape index: {}]   ;;  %s1584_s6 = inlined_call_operand.vmem [shape: f32[8,1], index: 6, kind: input, shape index: {}]   ;;  %s1585_s7 = inlined_call_operand.hbm [shape: f32[8,1024], index: 7, kind: output, shape index: {0}]   ;;  %s1586_s8 = inlined_call_operand.vmem [shape: f32[1,16,1], index: 8, kind: output, shape index: {1}]  }
   0x1   :  { %15 = vsyncpa [#allocation6], 0 }
   0x2   :  { %16 = vsyncpa [#allocation4], 0  ;;  %s1080_s27 = smov [#allocation5]   ;;  %s1081_s29 = smov [#allocation2]  }
   0x3   :  { %s39_s28 = sshll.u32 %s1080_s27, 4  ;;  %s29_s30 = sshll.u32 %s1081_s29, 4  ;;  %s40_s28 = int_to_ptr.vmem [resolvable:$true] %s39_s28  ;;  %s1142_s30 = int_to_ptr.vmem [resolvable:$true] %s29_s30 }
   0x4   :  { %s983_s6 = scalar_lea.hbm %s1579_s1, 896  ;;  %s985_s14 = scalar_lea.hbm %s1579_s1, 1024 }
   0x5   :  { %p984_p0 = scmp.ne.s32.totalorder %s1579_s1, %s983_s6  ;;  %p986_p1 = scmp.lt.u32.totalorder %s985_s14, %s983_s6 }
   0x6   :  { %p987_p2 = scmp.lt.u32.totalorder %s983_s6, %s1579_s1 }
   0x8   :  { %p988_p3 = por %p987_p2, %p986_p1 }
   0xa   :  { %p989_p4 = pnand %p988_p3, %p984_p0 }
   0xc   :  { %992 = shalt.err (!%p989_p4)
}
   0xd   :  { %s993_s17 = scalar_lea.vmem %s40_s28, 896  ;;  %p998_p6 = scmp.lt.s32.totalorder %s40_s28, %s40_s28 }
   0xe   :  { %p994_p5 = scmp.ne.s32.totalorder %s40_s28, %s993_s17  ;;  %p999_p7 = scmp.lt.s32.totalorder %s993_s17, %s993_s17 }
  0x10   :  { %p1000_p8 = por %p999_p7, %p998_p6 }
  0x12   :  { %p1001_p9 = pnand %p1000_p8, %p994_p5 }
  0x14   :  { %1004 = shalt.err (!%p1001_p9)
}
  0x15   :  { %42 = dma.hbm_to_vmem [thread:$0]  %s1579_s1, 896, %s40_s28, [#allocation6]  }
  0x16   :  { %s1005_s22 = scalar_lea.hbm %s1578_s0, 128  ;;  %s1007_s27 = scalar_lea.hbm %s1578_s0, 1024 }
  0x17   :  { %p1006_p10 = scmp.ne.s32.totalorder %s1578_s0, %s1005_s22  ;;  %p1008_p11 = scmp.lt.u32.totalorder %s1007_s27, %s1005_s22 }
  0x18   :  { %p1009_p12 = scmp.lt.u32.totalorder %s1005_s22, %s1578_s0 }
  0x1a   :  { %p1010_p13 = por %p1009_p12, %p1008_p11 }
  0x1c   :  { %p1011_p0 = pnand %p1010_p13, %p1006_p10 }
  0x1e   :  { %1014 = shalt.err (!%p1011_p0)
}
  0x1f   :  { %s1015_s1 = scalar_lea.vmem %s1142_s30, 128  ;;  %p1020_p2 = scmp.lt.s32.totalorder %s1142_s30, %s1142_s30 }
  0x20   :  { %p1016_p1 = scmp.ne.s32.totalorder %s1142_s30, %s1015_s1  ;;  %p1021_p3 = scmp.lt.s32.totalorder %s1015_s1, %s1015_s1 }
  0x22   :  { %p1022_p4 = por %p1021_p3, %p1020_p2 }
  0x24   :  { %p1023_p5 = pnand %p1022_p4, %p1016_p1 }
  0x26   :  { %1026 = shalt.err (!%p1023_p5)
}
  0x27   :  { %32 = dma.hbm_to_vmem [thread:$0]  %s1578_s0, 128, %s1142_s30, [#allocation3]  }
  0x28   :  { %s731_s11 = scalar_lea.hbm %s1580_s2, 896  ;;  %s1082_s12 = smov [#allocation7]  }
  0x29   :  { %s53_s13 = sshll.u32 %s1082_s12, 4  ;;  %s1051_s16 = scalar_lea.hbm %s1580_s2, 1024  ;;  %s54_s13 = int_to_ptr.vmem [resolvable:$true] %s53_s13 }
  0x2a   :  { %p1028_p6 = scmp.ne.s32.totalorder %s731_s11, %s1051_s16  ;;  %p1030_p7 = scmp.lt.u32.totalorder %s731_s11, %s1580_s2 }
  0x2b   :  { %p1031_p8 = scmp.lt.u32.totalorder %s1051_s16, %s1051_s16  ;;  %p1033_p10 = scmp.lt.u32.totalorder %s1051_s16, %s731_s11 }
  0x2d   :  { %p1032_p9 = por %p1031_p8, %p1030_p7 }
  0x2f   :  { %p1034_p11 = por %p1033_p10, %p1032_p9 }
  0x31   :  { %p1035_p12 = pnand %p1034_p11, %p1028_p6 }
  0x33   :  { %1038 = shalt.err (!%p1035_p12)
}
  0x34   :  { %s1039_s0 = scalar_lea.vmem %s54_s13, 128  ;;  %p1044_p0 = scmp.lt.s32.totalorder %s54_s13, %s54_s13 }
  0x35   :  { %p1040_p13 = scmp.ne.s32.totalorder %s54_s13, %s1039_s0  ;;  %p1045_p1 = scmp.lt.s32.totalorder %s1039_s0, %s1039_s0 }
  0x37   :  { %p1046_p2 = por %p1045_p1, %p1044_p0 }
  0x39   :  { %p1047_p3 = pnand %p1046_p2, %p1040_p13 }
  0x3b   :  { %1050 = shalt.err (!%p1047_p3)
}
  0x3c   :  { %56 = dma.hbm_to_vmem [thread:$0]  %s731_s11, 128, %s54_s13, [#allocation6]  }
  0x3d   :  { %1074 = dma.done.wait [#allocation3], 128  }
  0x3e   :  { %1075 = vsyncadd [#allocation3], 4294967168 }
  0x3f   :  { %1076 = dma.done.wait [#allocation6], 1024  }
  0x40   :  { %1077 = vsyncadd [#allocation6], 4294966272  ;;  %v95_v0 = vlaneseq  ;;  %v89_v6 = vld [vmem:[%s1581_s3] sm:$0xff]  ;;  %v1202_v9 = vld [vmem:[#allocation5] sm:$0xff]  ;;  %v1083_v10 = vmov 0   ;;  %s1084_s19 = smov 19  }
  0x41   :  { %vm91_vm0 = vcmp.gt.f32.partialorder %v89_v6, 0.5  ;;  %v1207_v12 = vld [vmem:[#allocation5 + $0x8] sm:$0xff]  ;;  %v80_v15 = vld [vmem:[#allocation2] sm:$0xff]  ;;  %v1219_v16 = vld [vmem:[#allocation5 + $0x10] sm:$0xff]  ;;  %s1085_s20 = smov 18   ;;  %s1086_s21 = smov 17  }
  0x42   :  { %v1189_v1 = vshrl.u32 %v95_v0, 7  ;;  %v1205_v11 = vsel %vm91_vm0, 1, %v1083_v10  ;;  %v1253_v27 = vld [vmem:[#allocation5 + $0x18] sm:$0xff]  ;;  %v1255_v28 = vld [vmem:[#allocation5 + $0x20] sm:$0xff]  ;;  %s1087_s22 = smov 1   ;;  %v1281_v34 = vld [vmem:[#allocation5 + $0x28] sm:$0xff] }
  0x43   :  { %s1088_s23 = smov 127   ;;  %s1089_s24 = smov 111   ;;  %v1298_v41 = vld [vmem:[#allocation5 + $0x30] sm:$0xff]  ;;  %v1091_v44 = vmov 0.0   ;;  %v90_v45 = vld [vmem:[%s1581_s3 + $0x8] sm:$0x1] }
  0x44   :  { %v101_v2 = vsub.s32 1, %v1189_v1  ;;  %v105_v3 = vsub.s32 2, %v1189_v1  ;;  %v1194_v4 = vsub.s32 0, %v1189_v1  ;;  %v109_v5 = vsub.s32 3, %v1189_v1  ;;  %s1090_s25 = smov 110   ;;  %412 = vmatprep.mubr.f32.mxu0 %v1091_v44  ;;  %483 = vmatprep.mubr.f32.mxu1 %v1091_v44  ;;  %s1092_s26 = smov 109  }
  0x45   :  { %v113_v7 = vsub.s32 4, %v1189_v1  ;;  %v117_v8 = vsub.s32 5, %v1189_v1  ;;  %v121_v32 = vsub.s32 6, %v1189_v1  ;;  %v125_v38 = vsub.s32 7, %v1189_v1  ;;  %v88_v48 = vld [vmem:[#allocation7] sm:$0xff] }
  0x46   :  { %v1212_v13 = vrot.slane %v1205_v11, %v101_v2  ;;  %v1217_v14 = vrot.slane %v1205_v11, %v105_v3  ;;  %v98_v17 = vrot.slane %v1205_v11, %v1194_v4  ;;  %v1226_v18 = vrot.slane %v1205_v11, %v109_v5 }
  0x47   :  { %v1231_v19 = vrot.slane %v1205_v11, %v113_v7  ;;  %v1236_v20 = vrot.slane %v1205_v11, %v117_v8  ;;  %v1277_v33 = vrot.slane %v1205_v11, %v121_v32  ;;  %v1294_v40 = vrot.slane %v1205_v11, %v125_v38 }
  0x48   :  { %vm132_vm1 = vcmp.eq.s32.totalorder %v1212_v13, 1  ;;  %vm133_vm2 = vcmp.eq.s32.totalorder %v1217_v14, 1  ;;  %vm131_vm3 = vcmp.eq.s32.totalorder %v98_v17, 1  ;;  %vm134_vm4 = vcmp.eq.s32.totalorder %v1226_v18, 1 }
  0x49   :  { %v1244_v21 = vsel %vm132_vm1, %v1202_v9, 0.0  ;;  %v142_v22 = vsel %vm133_vm2, %v1207_v12, 0.0  ;;  %v140_v23 = vsel %vm131_vm3, %v80_v15, 0.0  ;;  %v143_v24 = vsel %vm134_vm4, %v1219_v16, 0.0 }
  0x4a   :  { %v858_v25 = vpack.i.bf16 %v142_v22, %v1244_v21  ;;  %v868_v26 = vpack.i.bf16 %v143_v24, %v140_v23  ;;  %vm135_vm5 = vcmp.eq.s32.totalorder %v1231_v19, 1  ;;  %vm136_vm6 = vcmp.eq.s32.totalorder %v1236_v20, 1 }
  0x4b   :  { %v144_v29 = vsel %vm135_vm5, %v1253_v27, 0.0  ;;  %v145_v30 = vsel %vm136_vm6, %v1255_v28, 0.0  ;;  %vm137_vm7 = vcmp.eq.s32.totalorder %v1277_v33, 1  ;;  %v918_v35 = vpack.i.bf16 %v143_v24, %v142_v22 }
  0x4c   :  { %859 = vrot.lane.b32.xlu0 %v858_v25, %s1084_s19  ;;  %869 = vrot.lane.b32.xlu1 %v868_v26, %s1084_s19  ;;  %v878_v31 = vpack.i.bf16 %v145_v30, %v144_v29  ;;  %v923_v36 = vpack.i.bf16 %v144_v29, %v1244_v21  ;;  %v146_v37 = vsel %vm137_vm7, %v1281_v34, 0.0  ;;  %vm138_vm8 = vcmp.eq.s32.totalorder %v1294_v40, 1 }
  0x4d   :  { %v928_v39 = vpack.i.bf16 %v146_v37, %v145_v30  ;;  %v147_v42 = vsel %vm138_vm8, %v1298_v41, 0.0  ;;  %vm92_vm9 = vcmp.gt.f32.partialorder %v90_v45, 0.5  ;;  %v1328_v52 = vand.u32 127, %v95_v0 }
  0x4e   :  { %v953_v43 = vpack.i.bf16 %v147_v42, %v146_v37  ;;  %v94_v46 = vsel %vm92_vm9, 1, %v1083_v10  ;;  %vm1093_vm0 = vmmov 1  }
  0x4f   :  { %v130_v47 = vrot.slane %v94_v46, %v1194_v4  ;;  %vm167_vm11 = vcmp.lt.s32.totalorder %v1328_v52, 19  ;;  %vm191_vm12 = vcmp.lt.s32.totalorder %v1328_v52, 18  ;;  %vm215_vm13 = vcmp.lt.s32.totalorder %v1328_v52, 17  ;;  %vm783_vm3 = vmpackc.low %vm1093_vm0, %vm133_vm2 }
  0x50   :  { %864 = vrot.lane.b32.xlu0 %v858_v25, %s1085_s20  ;;  %874 = vrot.lane.b32.xlu1 %v868_v26, %s1085_s20  ;;  %vm239_vm14 = vcmp.lt.s32.totalorder %v1328_v52, 1  ;;  %vm263_vm15 = vcmp.lt.s32.totalorder %v1328_v52, 127  ;;  %vm786_vm9 = vmpackc.low %vm1093_vm0, %vm132_vm1 }
  0x51   :  { %vm139_vm10 = vcmp.eq.s32.totalorder %v130_v47, 1  ;;  %vm801_vm2 = vmpackc.low %vm1093_vm0, %vm135_vm5  ;;  %vm344_vm5 = vcmask 588800  }
  0x52   :  { %v148_v49 = vsel %vm139_vm10, %v88_v48, 0.0  ;;  %vm804_vm1 = vmpackc.low %vm1093_vm0, %vm134_vm4  ;;  %vm287_vm10 = vcmp.lt.s32.totalorder %v1328_v52, 111  ;;  %vm335_vm4 = vcmp.lt.s32.totalorder %v1328_v52, 109 }
  0x54   :  { %879 = vrot.lane.b32.xlu0 %v878_v31, %s1084_s19  ;;  %884 = vrot.lane.b32.xlu1 %v878_v31, %s1085_s20 }
  0x58   :  { %889 = vrot.lane.b32.xlu0 %v858_v25, %s1086_s21  ;;  %894 = vrot.lane.b32.xlu1 %v858_v25, %s1087_s22 }
  0x5c   :  { %899 = vrot.lane.b32.xlu0 %v868_v26, %s1086_s21  ;;  %904 = vrot.lane.b32.xlu1 %v868_v26, %s1087_s22 }
  0x60   :  { %909 = vrot.lane.b32.xlu0 %v878_v31, %s1086_s21  ;;  %914 = vrot.lane.b32.xlu1 %v878_v31, %s1087_s22 }
  0x64   :  { %919 = vrot.lane.b32.xlu0 %v918_v35, %s1088_s23  ;;  %924 = vrot.lane.b32.xlu1 %v923_v36, %s1088_s23 }
  0x68   :  { %929 = vrot.lane.b32.xlu0 %v928_v39, %s1088_s23  ;;  %934 = vrot.lane.b32.xlu1 %v918_v35, %s1089_s24 }
  0x6c   :  { %939 = vrot.lane.b32.xlu0 %v918_v35, %s1090_s25  ;;  %944 = vrot.lane.b32.xlu1 %v923_v36, %s1089_s24 }
  0x70   :  { %949 = vrot.lane.b32.xlu0 %v923_v36, %s1090_s25  ;;  %279 = vrot.lane.b32.xlu1 %v145_v30, %s1089_s24 }
  0x74   :  { %303 = vrot.lane.b32.xlu0 %v145_v30, %s1090_s25  ;;  %954 = vrot.lane.b32.xlu1 %v953_v43, %s1084_s19 }
  0x78   :  { %959 = vrot.lane.b32.xlu0 %v953_v43, %s1085_s20  ;;  %321 = vrot.lane.b32.xlu1 %v142_v22, %s1092_s26 }
  0x7c   :  { %323 = vrot.lane.b32.xlu0 %v143_v24, %s1092_s26  ;;  %319 = vrot.lane.b32.xlu1 %v1244_v21, %s1092_s26 }
  0x80   :  { %964 = vrot.lane.b32.xlu0 %v953_v43, %s1086_s21  ;;  %969 = vrot.lane.b32.xlu1 %v953_v43, %s1087_s22 }
  0x84   :  { %325 = vrot.lane.b32.xlu0 %v144_v29, %s1092_s26  ;;  %327 = vrot.lane.b32.xlu1 %v145_v30, %s1092_s26 }
  0x88   :  { %259 = vrot.lane.b32.xlu0 %v147_v42, %s1088_s23  ;;  %974 = vrot.lane.b32.xlu1 %v953_v43, %s1089_s24 }
  0x8c   :  { %979 = vrot.lane.b32.xlu0 %v953_v43, %s1090_s25  ;;  %261 = vrot.lane.b32.xlu1 %v148_v49, %s1088_s23 }
  0x90   :  { %285 = vrot.lane.b32.xlu0 %v148_v49, %s1089_s24  ;;  %309 = vrot.lane.b32.xlu1 %v148_v49, %s1090_s25 }
  0x94   :  { %329 = vrot.lane.b32.xlu0 %v146_v37, %s1092_s26  ;;  %331 = vrot.lane.b32.xlu1 %v147_v42, %s1092_s26 }
  0x98   :  { %333 = vrot.lane.b32.xlu0 %v148_v49, %s1092_s26 }
  0xbe   :  { %v860_v50 = vpop.permute.xlu0 %859  ;;  %v870_v51 = vpop.permute.xlu1 %869 }
  0xbf   :  { %v862_v53 = vunpack.i.h.bf16 %v860_v50  ;;  %v861_v54 = vunpack.i.l.bf16 %v860_v50  ;;  %v871_v55 = vunpack.i.l.bf16 %v870_v51  ;;  %v872_v62 = vunpack.i.h.bf16 %v870_v51 }
  0xc1   :  { %v173_v63 = vsel %vm167_vm11, %v861_v54, %v862_v53  ;;  %v174_v6 = vsel %vm167_vm11, %v871_v55, %v861_v54  ;;  %v172_v31 = vsel %vm167_vm11, %v862_v53, %v872_v62 }
  0xc2   :  { %v865_v56 = vpop.permute.xlu0 %864  ;;  %v875_v57 = vpop.permute.xlu1 %874 }
  0xc3   :  { %v867_v58 = vunpack.i.h.bf16 %v865_v56  ;;  %v866_v59 = vunpack.i.l.bf16 %v865_v56  ;;  %v877_v60 = vunpack.i.h.bf16 %v875_v57  ;;  %v876_v61 = vunpack.i.l.bf16 %v875_v57 }
  0xc5   :  { %v197_v0 = vsel %vm191_vm12, %v866_v59, %v867_v58  ;;  %v198_v15 = vsel %vm191_vm12, %v876_v61, %v866_v59  ;;  %v196_v26 = vsel %vm191_vm12, %v867_v58, %v877_v60 }
  0xc6   :  { %v1340_v17 = vpop.permute.xlu0 %879  ;;  %v1342_v21 = vpop.permute.xlu1 %884  ;;  %v774_v22 = vpack.c.bf16 %v197_v0, %v173_v63  ;;  %v776_v23 = vpack.c.bf16 %v198_v15, %v174_v6  ;;  %v794_v38 = vpack.c.bf16 %v196_v26, %v172_v31 }
  0xc7   :  { %v881_v24 = vunpack.i.l.bf16 %v1340_v17  ;;  %v886_v25 = vunpack.i.l.bf16 %v1342_v21 }
  0xc8   :  { %775 = vmatprep.subr.bf16.mxu0 %v774_v22 }
  0xc9   :  { %777 = vmatpush1.bf16.msra.mxu0 %v776_v23  ;;  %v171_v29 = vsel %vm167_vm11, %v872_v62, %v881_v24  ;;  %v195_v30 = vsel %vm191_vm12, %v877_v60, %v886_v25 }
  0xca   :  { %v890_v35 = vpop.permute.xlu0 %889  ;;  %v895_v36 = vpop.permute.xlu1 %894  ;;  %v792_v37 = vpack.c.bf16 %v195_v30, %v171_v29 }
  0xcb   :  { %v892_v39 = vunpack.i.h.bf16 %v890_v35  ;;  %v891_v42 = vunpack.i.l.bf16 %v890_v35  ;;  %v897_v43 = vunpack.i.h.bf16 %v895_v36  ;;  %v896_v45 = vunpack.i.l.bf16 %v895_v36 }
  0xcc   :  { %793 = vmatprep.subr.bf16.mxu1 %v792_v37 }
  0xcd   :  { %795 = vmatpush1.bf16.msra.mxu1 %v794_v38  ;;  %v221_v46 = vsel %vm215_vm13, %v891_v42, %v892_v39  ;;  %v245_v47 = vsel %vm239_vm14, %v896_v45, %v897_v43 }
  0xce   :  { %v900_v48 = vpop.permute.xlu0 %899  ;;  %v905_v49 = vpop.permute.xlu1 %904  ;;  %v778_v50 = vpack.c.bf16 %v245_v47, %v221_v46 }
  0xcf   :  { %v901_v51 = vunpack.i.l.bf16 %v900_v48  ;;  %v906_v53 = vunpack.i.l.bf16 %v905_v49  ;;  %v902_v54 = vunpack.i.h.bf16 %v900_v48  ;;  %v907_v55 = vunpack.i.h.bf16 %v905_v49 }
  0xd0   :  { %779 = vmatprep.subr.bf16.mxu0 %v778_v50 }
  0xd1   :  { %v222_v56 = vsel %vm215_vm13, %v901_v51, %v891_v42  ;;  %v246_v57 = vsel %vm239_vm14, %v906_v53, %v896_v45  ;;  %v220_v63 = vsel %vm215_vm13, %v892_v39, %v902_v54  ;;  %v244_v0 = vsel %vm239_vm14, %v897_v43, %v907_v55 }
  0xd2   :  { %v1368_v58 = vpop.permute.xlu0 %909  ;;  %v1370_v59 = vpop.permute.xlu1 %914  ;;  %v780_v60 = vpack.c.bf16 %v246_v57, %v222_v56  ;;  %v798_v35 = vpack.c.bf16 %v244_v0, %v220_v63 }
  0xd3   :  { %v911_v61 = vunpack.i.l.bf16 %v1368_v58  ;;  %v916_v62 = vunpack.i.l.bf16 %v1370_v59 }
  0xd4   :  { %781 = vmatpush1.bf16.msra.mxu0 %v780_v60 }
  0xd5   :  { %v219_v6 = vsel %vm215_vm13, %v902_v54, %v911_v61  ;;  %v243_v15 = vsel %vm239_vm14, %v907_v55, %v916_v62 }
  0xd6   :  { %v920_v22 = vpop.permute.xlu0 %919  ;;  %v925_v23 = vpop.permute.xlu1 %924  ;;  %v796_v26 = vpack.c.bf16 %v243_v15, %v219_v6 }
  0xd7   :  { %v922_v29 = vunpack.i.h.bf16 %v920_v22  ;;  %v921_v30 = vunpack.i.l.bf16 %v920_v22  ;;  %v926_v31 = vunpack.i.l.bf16 %v925_v23  ;;  %v927_v36 = vunpack.i.h.bf16 %v925_v23 }
  0xd8   :  { %797 = vmatprep.subr.bf16.mxu1 %v796_v26 }
  0xd9   :  { %v269_v37 = vsel %vm263_vm15, %v921_v30, %v922_v29  ;;  %v270_v38 = vsel %vm263_vm15, %v926_v31, %v921_v30  ;;  %799 = vmatpush1.bf16.msra.mxu1 %v798_v35  ;;  %v268_v47 = vsel %vm263_vm15, %v922_v29, %v927_v36 }
  0xda   :  { %v782_v39 = vpack.c.bf16 %v269_v37, %v1207_v12  ;;  %v785_v42 = vpack.c.bf16 %v270_v38, %v1202_v9  ;;  %v1396_v43 = vpop.permute.xlu0 %929  ;;  %v935_v45 = vpop.permute.xlu1 %934  ;;  %v803_v50 = vpack.c.bf16 %v268_v47, %v1219_v16  ;;  %v887_v37 = vunpack.i.h.bf16 %v1342_v21 }
  0xdb   :  { %v931_v46 = vunpack.i.l.bf16 %v1396_v43  ;;  %v937_v14 = vunpack.i.h.bf16 %v935_v45  ;;  %v936_v9 = vunpack.i.l.bf16 %v935_v45  ;;  %v912_v21 = vunpack.i.h.bf16 %v1368_v58 }
  0xdc   :  { %784 = vmatprep.subr.msk.bf16.mxu0 %vm783_vm3, %v782_v39  ;;  %vm311_vm3 = vcmp.lt.s32.totalorder %v1328_v52, 110 }
  0xdd   :  { %v267_v12 = vsel %vm263_vm15, %v927_v36, %v931_v46  ;;  %787 = vmatpush1.bf16.msk.msra.mxu0 %vm786_vm9, %v785_v42  ;;  %v882_v36 = vunpack.i.h.bf16 %v1340_v17  ;;  %v1462_v17 = vld [vmem:[%s1582_s4] sm:$0xff]  ;;  %s1096_s4 = smov [#allocation8]  }
  0xde   :  { %v800_v13 = vpack.c.bf16 %v267_v12, %v1253_v27  ;;  %v940_v48 = vpop.permute.xlu0 %939  ;;  %v945_v49 = vpop.permute.xlu1 %944  ;;  %v293_v27 = vsel %vm287_vm10, %v936_v9, %v937_v14  ;;  %s715_s1 = sshll.u32 %s1096_s4, 4  ;;  %s716_s1 = int_to_ptr.vmem [resolvable:$true] %s715_s1 }
  0xdf   :  { %v942_v51 = vunpack.i.h.bf16 %v940_v48  ;;  %v941_v53 = vunpack.i.l.bf16 %v940_v48  ;;  %v946_v19 = vunpack.i.l.bf16 %v945_v49  ;;  %v947_v63 = vunpack.i.h.bf16 %v945_v49  ;;  %s1052_s28 = scalar_lea.vmem %s716_s1, 896  ;;  %p1057_p5 = scmp.lt.s32.totalorder %s716_s1, %s716_s1 }
  0xe0   :  { %802 = vmatprep.subr.msk.bf16.mxu1 %vm801_vm2, %v800_v13  ;;  %v170_v12 = vsel %vm167_vm11, %v881_v24, %v882_v36  ;;  %v917_v24 = vunpack.i.h.bf16 %v1370_v59  ;;  %p1053_p4 = scmp.ne.s32.totalorder %s716_s1, %s1052_s28  ;;  %p1058_p6 = scmp.lt.s32.totalorder %s1052_s28, %s1052_s28 }
  0xe1   :  { %805 = vmatpush1.bf16.msk.msra.mxu1 %vm804_vm1, %v803_v50  ;;  %v317_v54 = vsel %vm311_vm3, %v941_v53, %v942_v51  ;;  %v294_v16 = vsel %vm287_vm10, %v946_v19, %v936_v9  ;;  %v292_v31 = vsel %vm287_vm10, %v937_v14, %v947_v63  ;;  %v194_v14 = vsel %vm191_vm12, %v886_v25, %v887_v37 }
  0xe2   :  { %v950_v18 = vpop.permute.xlu0 %949  ;;  %v1422_v55 = vpop.permute.xlu1 %279  ;;  %v788_v56 = vpack.c.bf16 %v317_v54, %v293_v27  ;;  %p1059_p7 = por %p1058_p6, %p1057_p5 }
  0xe3   :  { %v952_v57 = vunpack.i.h.bf16 %v950_v18  ;;  %v951_v60 = vunpack.i.l.bf16 %v950_v18  ;;  %v291_v26 = vsel %vm287_vm10, %v947_v63, %v1422_v55  ;;  %v932_v63 = vunpack.i.h.bf16 %v1396_v43 }
  0xe4   :  { %789 = vmatprep.subr.bf16.mxu0 %v788_v56  ;;  %v218_v56 = vsel %vm215_vm13, %v911_v61, %v912_v21  ;;  %p1060_p8 = pnand %p1059_p7, %p1053_p4 }
  0xe5   :  { %v318_v0 = vsel %vm311_vm3, %v951_v60, %v941_v53  ;;  %v316_v23 = vsel %vm311_vm3, %v942_v51, %v952_v57  ;;  %v812_v51 = vpack.c.bf16 %v194_v14, %v170_v12 }
  0xe6   :  { %v1428_v6 = vpop.permute.xlu0 %303  ;;  %v955_v15 = vpop.permute.xlu1 %954  ;;  %v790_v22 = vpack.c.bf16 %v318_v0, %v294_v16  ;;  %v808_v35 = vpack.c.bf16 %v316_v23, %v292_v31 }
  0xe7   :  { %v315_v29 = vsel %vm311_vm3, %v952_v57, %v1428_v6  ;;  %v956_v42 = vunpack.i.l.bf16 %v955_v15  ;;  %v242_v57 = vsel %vm239_vm14, %v916_v62, %v917_v24  ;;  %v957_v60 = vunpack.i.h.bf16 %v955_v15 }
  0xe8   :  { %v806_v30 = vpack.c.bf16 %v315_v29, %v291_v26  ;;  %791 = vmatpush1.bf16.msra.mxu0 %v790_v22  ;;  %v816_v29 = vpack.c.bf16 %v242_v57, %v218_v56  ;;  %v631_v57 = vrot.slane %v1205_v11, 1 }
  0xe9   :  { %v169_v50 = vsel %vm167_vm11, %v882_v36, %v956_v42 }
  0xea   :  { %v960_v38 = vpop.permute.xlu0 %959  ;;  %v322_v39 = vpop.permute.xlu1 %321  ;;  %807 = vmatprep.subr.bf16.mxu1 %v806_v30  ;;  %v168_v30 = vsel %vm167_vm11, %v956_v42, %v957_v60  ;;  %vm819_vm11 = vmpackc.low %vm1093_vm0, %vm137_vm7  ;;  %vm632_vm7 = vcmp.ne.s32.totalorder %v631_v57, 0 }
  0xeb   :  { %v961_v45 = vunpack.i.l.bf16 %v960_v38  ;;  %809 = vmatpush1.bf16.msra.mxu1 %v808_v35  ;;  %v962_v53 = vunpack.i.h.bf16 %v960_v38  ;;  %v266_v35 = vsel %vm263_vm15, %v931_v46, %v932_v63  ;;  %v633_v60 = vsel %vm632_vm7, 1, %v1083_v10 }
  0xec   :  { %v821_v46 = vpack.c.bf16 %v266_v35, %v1255_v28  ;;  %v645_v11 = vrot.slane %v633_v60, %v105_v3  ;;  %v653_v35 = vrot.slane %v633_v60, %v113_v7 }
  0xed   :  { %v193_v47 = vsel %vm191_vm12, %v887_v37, %v961_v45  ;;  %v192_v58 = vsel %vm191_vm12, %v961_v45, %v962_v53  ;;  %v1094_v45 = vmov 0.0|0.0   ;;  %vm1095_vm12 = vmmov 0  }
  0xee   :  { %v324_v9 = vpop.permute.xlu0 %323  ;;  %v320_v13 = vpop.permute.xlu1 %319  ;;  %v810_v25 = vpack.c.bf16 %v193_v47, %v169_v50  ;;  %v829_v31 = vpack.c.bf16 %v192_v58, %v168_v30  ;;  %vm666_vm9 = vcmp.eq.s32.totalorder %v653_v35, 1 }
  0xef   :  { %v341_v48 = vsel %vm335_vm4, %v322_v39, %v324_v9  ;;  %v342_v49 = vsel %vm335_vm4, %v320_v13, %v322_v39 }
  0xf0   :  { %364 = vmatprep.subr.mxu0 %v341_v48 }
  0xf1   :  { %365 = vmatpush1.msra.mxu0 %v342_v49 }
  0xf2   :  { %v965_v19 = vpop.permute.xlu0 %964  ;;  %v970_v27 = vpop.permute.xlu1 %969  ;;  %811 = vmatprep.subr.bf16.mxu0 %v810_v25  ;;  %734 = vmatmul.mubr.msk.f32.vlgmr.msra.gmra.mrb[0].mxu0 %vm344_vm5, %v1462_v17 }
  0xf3   :  { %v966_v54 = vunpack.i.l.bf16 %v965_v19  ;;  %v971_v18 = vunpack.i.l.bf16 %v970_v27  ;;  %813 = vmatpush1.bf16.msra.mxu0 %v812_v51  ;;  %554 = vmatprep.mubr.f32.mxu0 %v1091_v44  ;;  %v967_v22 = vunpack.i.h.bf16 %v965_v19  ;;  %v972_v23 = vunpack.i.h.bf16 %v970_v27 }
  0xf5   :  { %v217_v16 = vsel %vm215_vm13, %v912_v21, %v966_v54  ;;  %v241_v0 = vsel %vm239_vm14, %v917_v24, %v971_v18  ;;  %v216_v36 = vsel %vm215_vm13, %v966_v54, %v967_v22  ;;  %v240_v37 = vsel %vm239_vm14, %v971_v18, %v972_v23  ;;  %vm822_vm13 = vmpackc.low %vm1093_vm0, %vm136_vm6 }
  0xf6   :  { %v326_v61 = vpop.permute.xlu0 %325  ;;  %v328_v26 = vpop.permute.xlu1 %327  ;;  %v814_v59 = vpack.c.bf16 %v241_v0, %v217_v16  ;;  %v832_v47 = vpack.c.bf16 %v240_v37, %v216_v36  ;;  %vm836_vm6 = vmpackc.low %vm1093_vm0, %vm138_vm8  ;;  %v661_v36 = vrot.slane %v633_v60, %v121_v32 }
  0xf7   :  { %v339_v62 = vsel %vm335_vm4, %v326_v61, %v328_v26  ;;  %v340_v15 = vsel %vm335_vm4, %v324_v9, %v326_v61 }
  0xf8   :  { %435 = vmatprep.subr.mxu1 %v339_v62  ;;  %815 = vmatprep.subr.bf16.mxu0 %v814_v59  ;;  %vm668_vm1 = vcmp.eq.s32.totalorder %v661_v36, 1 }
  0xf9   :  { %436 = vmatpush1.msra.mxu1 %v340_v15  ;;  %817 = vmatpush1.bf16.msra.mxu0 %v816_v29 }
  0xfa   :  { %v260_v38 = vpop.permute.xlu0 %259  ;;  %v975_v39 = vpop.permute.xlu1 %974  ;;  %828 = vmatprep.subr.bf16.mxu1 %v1094_v45  ;;  %737 = vmatmul.mubr.msk.f32.vlgmr.msra.gmra.mrb[0].mxu1 %vm344_vm5, %v1462_v17 }
  0xfb   :  { %v265_v42 = vsel %vm263_vm15, %v932_v63, %v260_v38  ;;  %830 = vmatpush3.bf16.msra.mxu1 %v829_v31  ;;  %771 = vmatprep.mubr.msk.f32.mxu1 %vm1095_vm12, %v1091_v44  ;;  %v977_v12 = vunpack.i.h.bf16 %v975_v39  ;;  %v976_v14 = vunpack.i.l.bf16 %v975_v39  ;;  %v637_v63 = vrot.slane %v633_v60, %v1194_v4 }
  0xfc   :  { %v818_v43 = vpack.c.bf16 %v265_v42, %v1281_v34  ;;  %831 = vmatprep.subr.bf16.mxu1 %v1094_v45  ;;  %v649_v4 = vrot.slane %v633_v60, %v109_v5  ;;  %v657_v5 = vrot.slane %v633_v60, %v117_v8 }
  0xfd   :  { %v290_v20 = vsel %vm287_vm10, %v1422_v55, %v976_v14  ;;  %v289_v50 = vsel %vm287_vm10, %v976_v14, %v977_v12  ;;  %vm662_vm8 = vcmp.eq.s32.totalorder %v637_v63, 1 }
  0xfe   :  { %v980_v9 = vpop.permute.xlu0 %979  ;;  %v262_v13 = vpop.permute.xlu1 %261  ;;  %820 = vmatprep.subr.msk.bf16.mxu0 %vm819_vm11, %v818_v43  ;;  %vm665_vm0 = vcmp.eq.s32.totalorder %v649_v4, 1  ;;  %vm667_vm2 = vcmp.eq.s32.totalorder %v657_v5, 1 }
  0xff   :  { %v982_v33 = vunpack.i.h.bf16 %v980_v9  ;;  %v981_v48 = vunpack.i.l.bf16 %v980_v9  ;;  %v264_v49 = vsel %vm263_vm15, %v260_v38, %v262_v13  ;;  %823 = vmatpush1.bf16.msk.msra.mxu0 %vm822_vm13, %v821_v46  ;;  %833 = vmatpush3.bf16.msra.mxu1 %v832_v47  ;;  %vm664_vm15 = vcmp.eq.s32.totalorder %v645_v11, 1 }
 0x100   :  { %v835_v34 = vpack.c.bf16 %v264_v49, %v1298_v41  ;;  %834 = vmatprep.subr.bf16.mxu1 %v1094_v45 }
 0x101   :  { %v314_v28 = vsel %vm311_vm3, %v1428_v6, %v981_v48  ;;  %v313_v21 = vsel %vm311_vm3, %v981_v48, %v982_v33 }
 0x102   :  { %v826_v41 = vpack.c.bf16 %v314_v28, %v290_v20  ;;  %v286_v24 = vpop.permute.xlu0 %285  ;;  %v310_v25 = vpop.permute.xlu1 %309  ;;  %v824_v40 = vpack.c.bf16 %v313_v21, %v289_v50 }
 0x103   :  { %v288_v51 = vsel %vm287_vm10, %v977_v12, %v286_v24  ;;  %v312_v55 = vsel %vm311_vm3, %v982_v33, %v310_v25  ;;  %837 = vmatpush3.bf16.msk.msra.mxu1 %vm836_vm6, %v835_v34 }
 0x104   :  { %v839_v53 = vpack.c.bf16 %v312_v55, %v288_v51  ;;  %825 = vmatprep.subr.bf16.mxu0 %v824_v40  ;;  %838 = vmatprep.subr.bf16.mxu1 %v1094_v45 }
 0x105   :  { %827 = vmatpush1.bf16.msra.mxu0 %v826_v41 }
 0x106   :  { %v330_v6 = vpop.permute.xlu0 %329  ;;  %v332_v19 = vpop.permute.xlu1 %331 }
 0x107   :  { %v338_v27 = vsel %vm335_vm4, %v328_v26, %v330_v6  ;;  %840 = vmatpush3.bf16.msra.mxu1 %v839_v53  ;;  %v337_v54 = vsel %vm335_vm4, %v330_v6, %v332_v19 }
 0x108   :  { %506 = vmatprep.subr.mxu0 %v337_v54  ;;  %769 = vmatprep.subr.mxu1 %v1091_v44  ;;  %v641_v44 = vrot.slane %v633_v60, %v101_v2 }
 0x109   :  { %507 = vmatpush1.msra.mxu0 %v338_v27 }
 0x10a   :  { %v334_v18 = vpop.permute.xlu0 %333  ;;  %740 = vmatmul.mubr.msk.f32.vlgmr.msra.gmra.mrb[2].mxu0 %vm344_vm5, %v1462_v17  ;;  %vm663_vm14 = vcmp.eq.s32.totalorder %v641_v44, 1 }
 0x10b   :  { %v336_v56 = vsel %vm335_vm4, %v332_v19, %v334_v18 }
 0x10c   :  { %770 = vmatpush3.msra.mxu1 %v336_v56 }
 0x10d   :  { %772 = vmatmul.mubr.msk.f32.vlgmr.msra.gmra.mrb[2].mxu1 %vm344_vm5, %v1462_v17 }
 0x1c5   :  { %v414_v16 = vpop.f32.mrb[0].mxu0 }
 0x1c6   :  { %v669_v0 = vsel %vm662_vm8, %v414_v16, 0.0  ;;  %702 = vst [vmem:[#allocation8] sm:$0xff] %v414_v16  ;;  %v416_v52 = vpop.f32.mrb[1].mxu0 }
 0x1c7   :  { %v676_v58 = vmul.f32 %v669_v0, %v669_v0  ;;  %v670_v22 = vsel %vm663_vm14, %v416_v52, 0.0  ;;  %703 = vst [vmem:[#allocation8 + $0x8] sm:$0xff] %v416_v52 }
 0x1c8   :  { %v677_v17 = vmul.f32 %v670_v22, %v670_v22  ;;  %v683_v23 = vadd.f32 %v670_v22, %v669_v0 }
 0x1ca   :  { %v691_v10 = vadd.f32 %v677_v17, %v676_v58 }
 0x1cd   :  { %v485_v2 = vpop.f32.mrb[0].mxu1 }
 0x1ce   :  { %v671_v61 = vsel %vm664_vm15, %v485_v2, 0.0  ;;  %704 = vst [vmem:[#allocation8 + $0x10] sm:$0xff] %v485_v2  ;;  %v487_v26 = vpop.f32.mrb[1].mxu1 }
 0x1cf   :  { %v678_v59 = vmul.f32 %v671_v61, %v671_v61  ;;  %v684_v29 = vadd.f32 %v683_v23, %v671_v61  ;;  %v672_v62 = vsel %vm665_vm0, %v487_v26, 0.0  ;;  %705 = vst [vmem:[#allocation8 + $0x18] sm:$0xff] %v487_v26 }
 0x1d0   :  { %v679_v15 = vmul.f32 %v672_v62, %v672_v62 }
 0x1d1   :  { %v692_v30 = vadd.f32 %v691_v10, %v678_v59  ;;  %v685_v31 = vadd.f32 %v684_v29, %v672_v62 }
 0x1d3   :  { %v693_v3 = vadd.f32 %v692_v30, %v679_v15 }
 0x1dd   :  { %v556_v37 = vpop.f32.mrb[2].mxu0 }
 0x1de   :  { %v673_v38 = vsel %vm666_vm9, %v556_v37, 0.0  ;;  %706 = vst [vmem:[#allocation8 + $0x20] sm:$0xff] %v556_v37  ;;  %v558_v39 = vpop.f32.mrb[3].mxu0 }
 0x1df   :  { %v680_v45 = vmul.f32 %v673_v38, %v673_v38  ;;  %v686_v42 = vadd.f32 %v685_v31, %v673_v38  ;;  %v674_v43 = vsel %vm667_vm2, %v558_v39, 0.0  ;;  %707 = vst [vmem:[#allocation8 + $0x28] sm:$0xff] %v558_v39 }
 0x1e0   :  { %v681_v46 = vmul.f32 %v674_v43, %v674_v43  ;;  %v627_v47 = vpop.f32.mrb[2].mxu1 }
 0x1e1   :  { %v694_v7 = vadd.f32 %v693_v3, %v680_v45  ;;  %v687_v12 = vadd.f32 %v686_v42, %v674_v43  ;;  %v675_v14 = vsel %vm668_vm1, %v627_v47, 0.0  ;;  %708 = vst [vmem:[#allocation8 + $0x30] sm:$0xff] %v627_v47  ;;  %v773_v8 = vpop.f32.mrb[3].mxu1 }
 0x1e2   :  { %v682_v1 = vmul.f32 %v675_v14, %v675_v14 }
 0x1e3   :  { %v688_v32 = vadd.f32 %v687_v12, %v675_v14  ;;  %v695_v9 = vadd.f32 %v694_v7, %v681_v46 }
 0x1e5   :  { %689 = vadd.xlane.f32.xlu1 %v688_v32  ;;  %v696_v13 = vadd.f32 %v695_v9, %v682_v1 }
 0x1e7   :  { %697 = vadd.xlane.f32.xlu0 %v696_v13 }
 0x1e8   :  { %1063 = shalt.err (!%p1060_p8)
}
 0x1e9   :  { %s1064_s10 = scalar_lea.hbm %s1585_s7, 896  ;;  %s1066_s15 = scalar_lea.hbm %s1585_s7, 1024 }
 0x1ea   :  { %p1065_p9 = scmp.ne.s32.totalorder %s1585_s7, %s1064_s10  ;;  %p1067_p10 = scmp.lt.u32.totalorder %s1066_s15, %s1064_s10 }
 0x1eb   :  { %p1068_p11 = scmp.lt.u32.totalorder %s1064_s10, %s1585_s7 }
 0x1ed   :  { %p1069_p12 = por %p1068_p11, %p1067_p10 }
 0x1ef   :  { %p1070_p13 = pnand %p1069_p12, %p1065_p9 }
 0x1f1   :  { %1073 = shalt.err (!%p1070_p13)
}
 0x1f2   :  { %718 = dma.vmem_to_hbm [thread:$0]  %s716_s1, 896, %s1585_s7, [#allocation4]   ;;  %vm699_vm10 = vcmask 7168  }
 0x272   :  { %v690_v33 = vpop.xlane.xlu1 %689 }
 0x273   :  { %700 = vst.msk [vmem:[%s1586_s8] sm:$0xff] %vm699_vm10, %v690_v33 }
 0x274   :  { %v698_v48 = vpop.xlane.xlu0 %697 }
 0x275   :  { %701 = vst.msk [vmem:[%s1586_s8 + $0x8] sm:$0xff] %vm699_vm10, %v698_v48 }
 0x276   :  { %1078 = dma.done.wait [#allocation4], 896  }
 0x277   :  { %1079 = vsyncadd [#allocation4], 4294966400 }
 0x278   :  { %726 = vsyncpa [#allocation3], 1 }
 0x279   :  { %727 = vsyncpa [#allocation6], 1 }
 0x27a   :  { %728 = vsyncpa [#allocation4], 1 }

</bundles_post_ra>
